<compile_context>
chip_gen: v6e
topology: v6e:2x2x1
jax: 0.10.0
libtpu: 0.0.40
codegen_flags: <defaults>
</compile_context>

<pallas_src>
import jax
import jax.numpy as jnp
from jax.experimental import pallas as pl
from jax.experimental.pallas import tpu as pltpu


def _round_up(x, m):
    return (x + m - 1) // m * m


def _vmem_capacity():
    try:
        cap = int(pltpu.get_tpu_info().vmem_capacity_bytes)
        if cap > 0:
            return cap
    except Exception:
        pass
    return 64 * 1024 * 1024  # conservative per-TensorCore default (v7x)


# ----------------------------------------------------------------------------
# Kernels
# ----------------------------------------------------------------------------
def _mlp_kernel_resident(x_ref, w1_ref, b1_ref, w2_ref, b2_ref, o_ref):
    """o = relu(x @ W1 + b1) @ W2 + b2, whole weights VMEM-resident."""
    cdt = w1_ref.dtype
    x = x_ref[...].astype(cdt)                                            # cast fused in-kernel
    h = jnp.dot(x, w1_ref[...], preferred_element_type=jnp.float32)      # MXU, f32 acc
    h = jnp.maximum(h + b1_ref[...], 0.0).astype(cdt)                    # bias+ReLU+cast, once
    y = jnp.dot(h, w2_ref[...], preferred_element_type=jnp.float32) + b2_ref[...]
    o_ref[...] = y.astype(o_ref.dtype)                                   # lane-dense store


def _mlp_kernel_htiled(x_ref, w1_ref, b1_ref, w2_ref, b2_ref, o_ref, acc_ref):
    """Same MLP, but W1/W2 streamed over the hidden dim; f32 accumulator in scratch."""
    h_idx = pl.program_id(1)

    @pl.when(h_idx == 0)
    def _():
        acc_ref[...] = jnp.zeros_like(acc_ref)

    cdt = w1_ref.dtype
    x = x_ref[...].astype(cdt)
    h = jnp.dot(x, w1_ref[...], preferred_element_type=jnp.float32)
    h = jnp.maximum(h + b1_ref[...], 0.0).astype(cdt)
    acc_ref[...] += jnp.dot(h, w2_ref[...], preferred_element_type=jnp.float32)

    @pl.when(h_idx == pl.num_programs(1) - 1)
    def _():
        o_ref[...] = (acc_ref[...] + b2_ref[...]).astype(o_ref.dtype)


# ----------------------------------------------------------------------------
# Parameter preparation (pad + cast ONCE, reuse across calls)
# ----------------------------------------------------------------------------
def prepare_mlp_params(w1, b1, w2, b2, compute_dtype=jnp.bfloat16):
    """Pad lane dims (H, N) to 128 and cast weights to the compute dtype, once."""
    K, H = w1.shape
    N = w2.shape[1]
    Hp, Np = _round_up(H, 128), _round_up(N, 128)
    cdt = jnp.dtype(compute_dtype)

    w1_p = (w1.astype(cdt) if Hp == H
            else jnp.zeros((K, Hp), cdt).at[:, :H].set(w1.astype(cdt)))
    w2_p = (w2.astype(cdt) if (Hp, Np) == (H, N)
            else jnp.zeros((Hp, Np), cdt).at[:H, :N].set(w2.astype(cdt)))
    b1_p = jnp.zeros((1, Hp), jnp.float32).at[0, :H].set(b1.astype(jnp.float32))
    b2_p = jnp.zeros((1, Np), jnp.float32).at[0, :N].set(b2.astype(jnp.float32))
    return dict(w1=w1_p, b1=b1_p, w2=w2_p, b2=b2_p, K=K, N=N, Hp=Hp, Np=Np, cdt=cdt)


# ----------------------------------------------------------------------------
# Tiling selection against an explicit VMEM budget
# ----------------------------------------------------------------------------
def _select_tiling(M, K, Hp, Np, xbytes, cbytes, obytes, block_m, budget, h_block):
    def fp(bm, th):
        act = 2 * bm * K * xbytes + 2 * bm * Np * obytes       # double-buffered x / out tiles
        if th is None:                                          # resident, single-buffered weights
            w = (K * Hp + Hp * Np) * cbytes + (Hp + Np) * 4
            tmp = bm * Hp * (4 + cbytes) + bm * Np * 4
        else:                                                   # streamed weight blocks (x2 buffers)
            w = 2 * ((K * th + th * Np) * cbytes + (th + Np) * 4)
            tmp = bm * th * (4 + cbytes) + 2 * bm * Np * 4
        return w + act + tmp

    # >=2 row tiles whenever there is more than one minimal tile of work (v7x megacore),
    # sized to minimize tail padding.
    n_tiles = max(pl.cdiv(M, block_m), 2 if M > 8 else 1)
    bm = _round_up(pl.cdiv(M, n_tiles), 8)

    # Hidden-dim tile candidates: multiples of 128 that divide Hp exactly (descending).
    q = Hp // 128
    h_candidates = [128 * d for d in range(q, 0, -1) if q % d == 0]
    if h_block is not None:
        h_candidates = [t for t in h_candidates if t <= max(int(h_block), 128)] or [128]

    def pick_th(bm_):
        if h_block is None and fp(bm_, None) <= budget:
            return None, True
        for th in h_candidates:
            if fp(bm_, th) <= budget:
                return th, True
        return h_candidates[-1], False

    while True:
        th, fits = pick_th(bm)
        if fits or bm <= 8:
            break
        bm = max(8, _round_up(bm // 2, 8))
    return bm, th, fp(bm, th)


# ----------------------------------------------------------------------------
# Apply
# ----------------------------------------------------------------------------
def mlp_apply_prepared(x, prep, *, block_m=512, out_dtype=None, h_block=None,
                       single_buffer_weights=True):
    """y = relu(x @ W1 + b1) @ W2 + b2 for x of shape (..., K), one fused pallas_call."""
    w1_p, b1_p, w2_p, b2_p = prep["w1"], prep["b1"], prep["w2"], prep["b2"]
    K, N, Hp, Np, cdt = prep["K"], prep["N"], prep["Hp"], prep["Np"], prep["cdt"]

    lead = x.shape[:-1]
    assert x.shape[-1] == K, "input feature dim does not match W1"
    M = 1
    for d in lead:
        M *= d
    x2 = x.reshape(M, K)                       # kept in its original dtype; cast inside kernel
    out_dt = jnp.dtype(out_dtype) if out_dtype is not None else x.dtype

    cap = _vmem_capacity()
    budget = int(0.8 * cap)
    bm, th, fp_bytes = _select_tiling(
        M, K, Hp, Np,
        xbytes=x2.dtype.itemsize, cbytes=cdt.itemsize, obytes=out_dt.itemsize,
        block_m=block_m, budget=budget, h_block=h_block)

    n_rows = pl.cdiv(M, bm)
    Mp = n_rows * bm
    if Mp != M:                                # skip the pad copy when already aligned
        x2 = jnp.zeros((Mp, K), x2.dtype).at[:M].set(x2)

    vmem_limit = int(min(cap, max(2 * fp_bytes + (1 << 20), 32 << 20)))
    out_shape = jax.ShapeDtypeStruct((Mp, Np), out_dt)

    if th is None:
        # Path A: whole W1/b1/W2/b2 resident in VMEM while activation row tiles stream.
        def run(weight_mode):
            if weight_mode is None:
                wspec = lambda shp: pl.BlockSpec(shp, lambda i: (0, 0))
            else:
                wspec = lambda shp: pl.BlockSpec(shp, lambda i: (0, 0),
                                                 pipeline_mode=weight_mode)
            return pl.pallas_call(
                _mlp_kernel_resident,
                grid=(n_rows,),
                in_specs=[
                    pl.BlockSpec((bm, K), lambda i: (i, 0)),   # activations: streamed row tiles
                    wspec((K, Hp)),                            # W1 resident
                    wspec((1, Hp)),                            # b1 resident
                    wspec((Hp, Np)),                           # W2 resident
                    wspec((1, Np)),                            # b2 resident
                ],
                out_specs=pl.BlockSpec((bm, Np), lambda i: (i, 0)),
                out_shape=out_shape,
                compiler_params=pltpu.CompilerParams(
                    dimension_semantics=("parallel",),         # row tiles shard across v7x cores
                    vmem_limit_bytes=vmem_limit),
            )(x2, w1_p, b1_p, w2_p, b2_p)

        out = None
        if single_buffer_weights:
            try:
                out = run(pl.Buffered(1))      # constant-index weights: 1 buffer, not 2
            except Exception:
                out = None
        if out is None:
            out = run(None)
    else:
        # Path B: stream W1/W2 over the hidden dim; f32 accumulator + pl.when init/finalize.
        n_h = Hp // th
        out = pl.pallas_call(
            _mlp_kernel_htiled,
            grid=(n_rows, n_h),
            in_specs=[
                pl.BlockSpec((bm, K), lambda i, h: (i, 0)),
                pl.BlockSpec((K, th), lambda i, h: (0, h)),
                pl.BlockSpec((1, th), lambda i, h: (0, h)),
                pl.BlockSpec((th, Np), lambda i, h: (h, 0)),
                pl.BlockSpec((1, Np), lambda i, h: (0, 0)),
            ],
            out_specs=pl.BlockSpec((bm, Np), lambda i, h: (i, 0)),
            out_shape=out_shape,
            scratch_shapes=[pltpu.VMEM((bm, Np), jnp.float32)],
            compiler_params=pltpu.CompilerParams(
                dimension_semantics=("parallel", "arbitrary"),
                vmem_limit_bytes=vmem_limit),
        )(x2, w1_p, b1_p, w2_p, b2_p)

    if (Mp, Np) != (M, N):                     # skip the slice copy when already aligned
        out = out[:M, :N]
    return out.reshape(*lead, N)


def mlp_apply(x, w1, b1, w2, b2, *, compute_dtype=jnp.bfloat16, **kwargs):
    """Convenience wrapper: prepare (pad + cast) params and apply in one call."""
    return mlp_apply_prepared(x, prepare_mlp_params(w1, b1, w2, b2, compute_dtype), **kwargs)


# ----------------------------------------------------------------------------
# Pure-JAX reference (correctness check only)
# ----------------------------------------------------------------------------
def _ref_mlp(x, w1, b1, w2, b2):
    return jnp.maximum(x @ w1 + b1, 0.0) @ w2 + b2


# ----------------------------------------------------------------------------
# Deterministic init matching nn.Linear(inp, 2*out) -> ReLU -> Linear(2*out, out)
# ----------------------------------------------------------------------------
def init_params(key, inp_dim, out_dim):
    k1, k2, k3, k4 = jax.random.split(key, 4)
    hid = 2 * out_dim
    return {
        "w1": 0.1 * jax.random.normal(k1, (inp_dim, hid), jnp.float32),
        "b1": 0.05 * jax.random.normal(k2, (hid,), jnp.float32),
        "w2": 0.1 * jax.random.normal(k3, (hid, out_dim), jnp.float32),
        "b2": 0.05 * jax.random.normal(k4, (out_dim,), jnp.float32),
    }


if __name__ == "__main__":
    INP_DIM, OUT_DIM = 16, 32              # hidden = 64
    B, S = 2, 8                            # small (batch, seq) leading dims

    key = jax.random.PRNGKey(0)
    k_p, k_x, k_g, k_p2, k_x2 = jax.random.split(key, 5)
    p = init_params(k_p, INP_DIM, OUT_DIM)

    x = jax.random.normal(k_x, (B, S, INP_DIM), jnp.float32)
    y_ref = _ref_mlp(x, p["w1"], p["b1"], p["w2"], p["b2"])

    # Default path: bf16 operands (f32 accumulation), params prepared once, 2 row tiles.
    prep = prepare_mlp_params(p["w1"], p["b1"], p["w2"], p["b2"])
    y = mlp_apply_prepared(x, prep)
    jax.block_until_ready(y)
    assert y.shape == (B, S, OUT_DIM)
    assert jnp.allclose(y, y_ref, rtol=3e-2, atol=3e-2)

    # f32 escape hatch, 2-D input path (exact check).
    g = jax.random.normal(k_g, (4, INP_DIM), jnp.float32)
    yg = mlp_apply(g, p["w1"], p["b1"], p["w2"], p["b2"], compute_dtype=jnp.float32)
    jax.block_until_ready(yg)
    assert yg.shape == (4, OUT_DIM)
    assert jnp.allclose(yg, _ref_mlp(g, p["w1"], p["b1"], p["w2"], p["b2"]),
                        rtol=1e-4, atol=1e-4)

    # H-tiled fallback (streams W1/W2 over the hidden dim with an f32 accumulator),
    # forced here via h_block and checked against the resident path and the reference.
    p2 = init_params(k_p2, 128, 128)       # hidden = 256 -> two 128-wide H tiles
    x2 = jax.random.normal(k_x2, (B, S, 128), jnp.float32)
    ref2 = _ref_mlp(x2, p2["w1"], p2["b1"], p2["w2"], p2["b2"])
    y2_res = mlp_apply(x2, p2["w1"], p2["b1"], p2["w2"], p2["b2"],
                       compute_dtype=jnp.float32)
    y2_til = mlp_apply(x2, p2["w1"], p2["b1"], p2["w2"], p2["b2"],
                       compute_dtype=jnp.float32, h_block=128)
    jax.block_until_ready((y2_res, y2_til))
    assert jnp.allclose(y2_til, y2_res, rtol=1e-3, atol=1e-3)
    assert jnp.allclose(y2_res, ref2, rtol=5e-3, atol=5e-3)

    # Optional bf16 output dtype (halves writeback when the consumer accepts it).
    y_bf = mlp_apply_prepared(x, prep, out_dtype=jnp.bfloat16)
    jax.block_until_ready(y_bf)
    assert y_bf.dtype == jnp.bfloat16
    assert jnp.allclose(y_bf.astype(jnp.float32), y_ref, rtol=5e-2, atol=5e-2)

    print("KERNEL_OK")
</pallas_src>

<mosaic_0001>
module attributes {stable_mosaic.version = 11 : i64} {
  func.func @_mlp_kernel_resident(%arg0: i32, %arg1: memref<8x16xf32, #tpu.memory_space<vmem>>, %arg2: memref<16x128xbf16, #tpu.memory_space<vmem>>, %arg3: memref<1x128xf32, #tpu.memory_space<vmem>>, %arg4: memref<128x128xbf16, #tpu.memory_space<vmem>>, %arg5: memref<1x128xf32, #tpu.memory_space<vmem>>, %arg6: memref<8x128xf32, #tpu.memory_space<vmem>>) attributes {dimension_semantics = [#tpu.dimension_semantics<parallel>], iteration_bounds = array<i64: 2>, scalar_prefetch = 0 : i64, scratch_operands = 0 : i64, tpu.core_type = #tpu.core_type<tc>, window_params = [{transform_indices = @transform_0, window_bounds = array<i64: 8, 16>}, {pipeline_mode = #tpu.pipeline_mode<synchronous>, transform_indices = @transform_1, window_bounds = array<i64: 16, 128>}, {pipeline_mode = #tpu.pipeline_mode<synchronous>, transform_indices = @transform_2, window_bounds = array<i64: 1, 128>}, {pipeline_mode = #tpu.pipeline_mode<synchronous>, transform_indices = @transform_3, window_bounds = array<i64: 128, 128>}, {pipeline_mode = #tpu.pipeline_mode<synchronous>, transform_indices = @transform_4, window_bounds = array<i64: 1, 128>}, {transform_indices = @transform_5, window_bounds = array<i64: 8, 128>}]} {
    %c0 = arith.constant 0 : index
    %c0_0 = arith.constant 0 : index
    %0 = vector.load %arg1[%c0, %c0_0] : memref<8x16xf32, #tpu.memory_space<vmem>>, vector<8x16xf32>
    %1 = arith.truncf %0 : vector<8x16xf32> to vector<8x16xbf16>
    %c0_1 = arith.constant 0 : index
    %c0_2 = arith.constant 0 : index
    %2 = vector.load %arg2[%c0_1, %c0_2] : memref<16x128xbf16, #tpu.memory_space<vmem>>, vector<16x128xbf16>
    %cst = arith.constant dense<0.000000e+00> : vector<8x128xf32>
    %3 = tpu.matmul %1, %2, %cst {dimension_numbers = #tpu.dot_dimension_numbers<[1], [0], [0], [1], [0, 0, 1, 1], [], []>} : vector<8x16xbf16>, vector<16x128xbf16>, vector<8x128xf32> -> vector<8x128xf32>
    %c0_3 = arith.constant 0 : index
    %c0_4 = arith.constant 0 : index
    %4 = vector.load %arg3[%c0_3, %c0_4] : memref<1x128xf32, #tpu.memory_space<vmem>>, vector<1x128xf32>
    %5 = vector.broadcast %4 : vector<1x128xf32> to vector<8x128xf32>
    %6 = arith.addf %3, %5 : vector<8x128xf32>
    %cst_5 = arith.constant 0.000000e+00 : f32
    %7 = vector.broadcast %cst_5 : f32 to vector<8x128xf32>
    %8 = arith.maximumf %6, %7 : vector<8x128xf32>
    %9 = arith.truncf %8 : vector<8x128xf32> to vector<8x128xbf16>
    %c0_6 = arith.constant 0 : index
    %c0_7 = arith.constant 0 : index
    %10 = vector.load %arg4[%c0_6, %c0_7] : memref<128x128xbf16, #tpu.memory_space<vmem>>, vector<128x128xbf16>
    %cst_8 = arith.constant dense<0.000000e+00> : vector<8x128xf32>
    %11 = tpu.matmul %9, %10, %cst_8 {dimension_numbers = #tpu.dot_dimension_numbers<[1], [0], [0], [1], [0, 0, 1, 1], [], []>} : vector<8x128xbf16>, vector<128x128xbf16>, vector<8x128xf32> -> vector<8x128xf32>
    %c0_9 = arith.constant 0 : index
    %c0_10 = arith.constant 0 : index
    %12 = vector.load %arg5[%c0_9, %c0_10] : memref<1x128xf32, #tpu.memory_space<vmem>>, vector<1x128xf32>
    %13 = vector.broadcast %12 : vector<1x128xf32> to vector<8x128xf32>
    %14 = arith.addf %11, %13 : vector<8x128xf32>
    %c0_11 = arith.constant 0 : index
    %c0_12 = arith.constant 0 : index
    %15 = vector.load %arg6[%c0_11, %c0_12] : memref<8x128xf32, #tpu.memory_space<vmem>>, vector<8x128xf32>
    tpu.vector_store %arg6[%c0_11, %c0_12], %14 {strides = array<i32>} : memref<8x128xf32, #tpu.memory_space<vmem>>, vector<8x128xf32>,
    return
  }
  func.func @transform_0(%arg0: i32) -> (i32, i32) {
    %c0_i32 = arith.constant 0 : i32
    %c0_i32_0 = arith.constant 0 : i32
    return %arg0, %c0_i32 : i32, i32
  }
  func.func @transform_1(%arg0: i32) -> (i32, i32) {
    %c0_i32 = arith.constant 0 : i32
    %c0_i32_0 = arith.constant 0 : i32
    %c0_i32_1 = arith.constant 0 : i32
    return %c0_i32, %c0_i32_0 : i32, i32
  }
  func.func @transform_2(%arg0: i32) -> (i32, i32) {
    %c0_i32 = arith.constant 0 : i32
    %c0_i32_0 = arith.constant 0 : i32
    %c0_i32_1 = arith.constant 0 : i32
    return %c0_i32, %c0_i32_0 : i32, i32
  }
  func.func @transform_3(%arg0: i32) -> (i32, i32) {
    %c0_i32 = arith.constant 0 : i32
    %c0_i32_0 = arith.constant 0 : i32
    %c0_i32_1 = arith.constant 0 : i32
    return %c0_i32, %c0_i32_0 : i32, i32
  }
  func.func @transform_4(%arg0: i32) -> (i32, i32) {
    %c0_i32 = arith.constant 0 : i32
    %c0_i32_0 = arith.constant 0 : i32
    %c0_i32_1 = arith.constant 0 : i32
    return %c0_i32, %c0_i32_0 : i32, i32
  }
  func.func @transform_5(%arg0: i32) -> (i32, i32) {
    %c0_i32 = arith.constant 0 : i32
    %c0_i32_0 = arith.constant 0 : i32
    return %arg0, %c0_i32 : i32, i32
  }
}

module attributes {stable_mosaic.version = 11 : i64} {
  func.func @_mlp_kernel_resident(%arg0: i32, %arg1: memref<8x16xf32, #tpu.memory_space<vmem>>, %arg2: memref<16x128xbf16, #tpu.memory_space<vmem>>, %arg3: memref<1x128xf32, #tpu.memory_space<vmem>>, %arg4: memref<128x128xbf16, #tpu.memory_space<vmem>>, %arg5: memref<1x128xf32, #tpu.memory_space<vmem>>, %arg6: memref<8x128xf32, #tpu.memory_space<vmem>>) attributes {dimension_semantics = [#tpu.dimension_semantics<parallel>], iteration_bounds = array<i64: 2>, scalar_prefetch = 0 : i64, scratch_operands = 0 : i64, tpu.core_type = #tpu.core_type<tc>, window_params = [{transform_indices = @transform_0, window_bounds = array<i64: 8, 16>}, {pipeline_mode = #tpu.pipeline_mode<synchronous>, transform_indices = @transform_1, window_bounds = array<i64: 16, 128>}, {pipeline_mode = #tpu.pipeline_mode<synchronous>, transform_indices = @transform_2, window_bounds = array<i64: 1, 128>}, {pipeline_mode = #tpu.pipeline_mode<synchronous>, transform_indices = @transform_3, window_bounds = array<i64: 128, 128>}, {pipeline_mode = #tpu.pipeline_mode<synchronous>, transform_indices = @transform_4, window_bounds = array<i64: 1, 128>}, {transform_indices = @transform_5, window_bounds = array<i64: 8, 128>}]} {
    %c0 = arith.constant 0 : index
    %c0_0 = arith.constant 0 : index
    %0 = vector.load %arg1[%c0, %c0_0] : memref<8x16xf32, #tpu.memory_space<vmem>>, vector<8x16xf32>
    %1 = arith.truncf %0 : vector<8x16xf32> to vector<8x16xbf16>
    %c0_1 = arith.constant 0 : index
    %c0_2 = arith.constant 0 : index
    %2 = vector.load %arg2[%c0_1, %c0_2] : memref<16x128xbf16, #tpu.memory_space<vmem>>, vector<16x128xbf16>
    %cst = arith.constant dense<0.000000e+00> : vector<8x128xf32>
    %3 = tpu.matmul %1, %2, %cst {dimension_numbers = #tpu.dot_dimension_numbers<[1], [0], [0], [1], [0, 0, 1, 1], [], []>} : vector<8x16xbf16>, vector<16x128xbf16>, vector<8x128xf32> -> vector<8x128xf32>
    %c0_3 = arith.constant 0 : index
    %c0_4 = arith.constant 0 : index
    %4 = vector.load %arg3[%c0_3, %c0_4] : memref<1x128xf32, #tpu.memory_space<vmem>>, vector<1x128xf32>
    %5 = vector.broadcast %4 : vector<1x128xf32> to vector<8x128xf32>
    %6 = arith.addf %3, %5 : vector<8x128xf32>
    %cst_5 = arith.constant 0.000000e+00 : f32
    %7 = vector.broadcast %cst_5 : f32 to vector<8x128xf32>
    %8 = arith.maximumf %6, %7 : vector<8x128xf32>
    %9 = arith.truncf %8 : vector<8x128xf32> to vector<8x128xbf16>
    %c0_6 = arith.constant 0 : index
    %c0_7 = arith.constant 0 : index
    %10 = vector.load %arg4[%c0_6, %c0_7] : memref<128x128xbf16, #tpu.memory_space<vmem>>, vector<128x128xbf16>
    %cst_8 = arith.constant dense<0.000000e+00> : vector<8x128xf32>
    %11 = tpu.matmul %9, %10, %cst_8 {dimension_numbers = #tpu.dot_dimension_numbers<[1], [0], [0], [1], [0, 0, 1, 1], [], []>} : vector<8x128xbf16>, vector<128x128xbf16>, vector<8x128xf32> -> vector<8x128xf32>
    %c0_9 = arith.constant 0 : index
    %c0_10 = arith.constant 0 : index
    %12 = vector.load %arg5[%c0_9, %c0_10] : memref<1x128xf32, #tpu.memory_space<vmem>>, vector<1x128xf32>
    %13 = vector.broadcast %12 : vector<1x128xf32> to vector<8x128xf32>
    %14 = arith.addf %11, %13 : vector<8x128xf32>
    %c0_11 = arith.constant 0 : index
    %c0_12 = arith.constant 0 : index
    %15 = vector.load %arg6[%c0_11, %c0_12] : memref<8x128xf32, #tpu.memory_space<vmem>>, vector<8x128xf32>
    tpu.vector_store %arg6[%c0_11, %c0_12], %14 {strides = array<i32>} : memref<8x128xf32, #tpu.memory_space<vmem>>, vector<8x128xf32>,
    return
  }
  func.func @transform_0(%arg0: i32) -> (i32, i32) {
    %c0_i32 = arith.constant 0 : i32
    %c0_i32_0 = arith.constant 0 : i32
    return %arg0, %c0_i32 : i32, i32
  }
  func.func @transform_1(%arg0: i32) -> (i32, i32) {
    %c0_i32 = arith.constant 0 : i32
    %c0_i32_0 = arith.constant 0 : i32
    %c0_i32_1 = arith.constant 0 : i32
    return %c0_i32, %c0_i32_0 : i32, i32
  }
  func.func @transform_2(%arg0: i32) -> (i32, i32) {
    %c0_i32 = arith.constant 0 : i32
    %c0_i32_0 = arith.constant 0 : i32
    %c0_i32_1 = arith.constant 0 : i32
    return %c0_i32, %c0_i32_0 : i32, i32
  }
  func.func @transform_3(%arg0: i32) -> (i32, i32) {
    %c0_i32 = arith.constant 0 : i32
    %c0_i32_0 = arith.constant 0 : i32
    %c0_i32_1 = arith.constant 0 : i32
    return %c0_i32, %c0_i32_0 : i32, i32
  }
  func.func @transform_4(%arg0: i32) -> (i32, i32) {
    %c0_i32 = arith.constant 0 : i32
    %c0_i32_0 = arith.constant 0 : i32
    %c0_i32_1 = arith.constant 0 : i32
    return %c0_i32, %c0_i32_0 : i32, i32
  }
  func.func @transform_5(%arg0: i32) -> (i32, i32) {
    %c0_i32 = arith.constant 0 : i32
    %c0_i32_0 = arith.constant 0 : i32
    return %arg0, %c0_i32 : i32, i32
  }
}

</mosaic_0001>

<bundles_post_ra>
// kernel: tpu_custom_call.1
= control target key start
LH: loop header
LB: loop body
LE: loop exit
PB: predicated region body
PF: predicated region fallthrough
CT: control target
= control target key end

     0   :  { %10 = vsyncpa [#allocation3], 0  ;;  %s1068_s0 = inlined_call_operand.hbm [shape: f32[16,16], index: 0, kind: input, shape index: {}]   ;;  %s1069_s1 = inlined_call_operand.hbm [shape: bf16[16,128], index: 1, kind: input, shape index: {}]   ;;  %s1070_s2 = inlined_call_operand.vmem [shape: f32[1,128], index: 2, kind: input, shape index: {}]   ;;  %s1071_s3 = inlined_call_operand.hbm [shape: bf16[128,128], index: 3, kind: input, shape index: {}]   ;;  %s1072_s4 = inlined_call_operand.vmem [shape: f32[1,128], index: 4, kind: input, shape index: {}]   ;;  %s1073_s5 = inlined_call_operand.hbm [shape: f32[16,128], index: 5, kind: output, shape index: {}]  }
   0x1   :  { %12 = vsyncpa [#allocation3 + $0x1], 0 }
   0x2   :  { %13 = vsyncpa [#allocation6], 0 }
   0x3   :  { %14 = vsyncpa [#allocation4], 0 }
   0x4   :  { %16 = vsyncpa [#allocation4 + $0x1], 0  ;;  %s881_s18 = smov 0   ;;  %s883_s19 = smov 0  }
   0x5   :  { %s885_s20 = smov 0   ;;  %s887_s21 = smov 0  }
   0x6 LB: > { %s902_s22 = sadd.s32 4294967295, %s841_s21   ;;  %s548_s23 = sadd.s32 4294967294, %s841_s21   ;;  %s841_s21 = sphi %s887_s21, %s1095_s21   ;;  %s837_s20 = sphi %s885_s20, %s1094_s20   ;;  %s833_s19 = sphi %s883_s19, %s1093_s19   ;;  %s829_s18 = sphi %s881_s18, %s1092_s18  }
   0x7   : > { %p42_p0 = scmp.ne.s32.totalorder %s833_s19, %s829_s18  ;;  %p1074_p1 = scmp.eq.s32.totalorder %s902_s22, 0 }
   0x8   : > { %p156_p3 = scmp.eq.s32.totalorder %s548_s23, 1  ;;  %p549_p5 = scmp.ge.s32.totalorder %s841_s21, 1 }
   0x9   : > { %p911_p4 = por %p1074_p1, %p42_p0  ;;  %p163_p7 = scmp.lt.s32.totalorder %s841_s21, 3 }
   0xa   : > { %p916_p6 = por %p156_p3, %p42_p0  ;;  %s843_s27 = smov [#allocation5]  }
   0xb   : > { %s1078_s24 = scalar_select %p911_p4, 1, 0 }
   0xc   : > { %s1079_s25 = scalar_select %p916_p6, 1, 0 }
   0xd   : > { %p921_p8 = pnand %p549_p5, %p163_p7  ;;  %s175_s28 = sshll.u32 %s843_s27, 4  ;;  %s176_s28 = int_to_ptr.vmem [resolvable:$true] %s175_s28 }
   0xe   : > { %s844_s30 = smov [#allocation7]   ;;  %s704_s7 = scalar_lea.vmem %s176_s28, 128 }
   0xf   : > { %s1080_s26 = scalar_select %p921_p8, 1, 0 }
  0x10   : > { %p625_p9 = pneg %p921_p8  ;;  %s191_s6 = sshll.u32 %s844_s30, 4  ;;  %s192_s6 = int_to_ptr.vmem [resolvable:$true] %s191_s6 }
  0x11   : > { %p705_p13 = scmp.ne.s32.totalorder %s176_s28, %s704_s7  ;;  %p712_p5 = scmp.lt.s32.totalorder %s176_s28, %s176_s28 }
  0x12   : > { %p930_p11 = pnand %p625_p9, %p1074_p1  ;;  %p713_p7 = scmp.lt.s32.totalorder %s704_s7, %s704_s7 }
  0x14   : > { %p695_p12 = pneg %p930_p11  ;;  %p714_p10 = por %p713_p7, %p712_p5 }
  0x16   : > { %p707_p0 = pnand %p705_p13, %p695_p12 }
  0x18   : > { %p708_p3 = pneg %p707_p0 }
  0x1a   : > { %p715_p9 = pnand %p714_p10, %p708_p3 }
  0x1c   : > { %718 = shalt.err (!%p715_p9)
}
  0x1d   : > { %s845_s8 = smov 64   ;;  %s846_s9 = smov 4  }
  0x1e   : > { %628 = dma.hbm_to_vmem [thread:$0]  (!%p930_p11), %s1069_s1, 128, %s176_s28, [#allocation6], %s845_s8, %s845_s8, %s846_s9  }
  0x1f   : > { %s730_s12 = scalar_lea.vmem %s192_s6, 1024  ;;  %p738_p2 = scmp.lt.s32.totalorder %s192_s6, %s192_s6 }
  0x20   : > { %p731_p1 = scmp.ne.s32.totalorder %s192_s6, %s730_s12  ;;  %p739_p6 = scmp.lt.s32.totalorder %s730_s12, %s730_s12 }
  0x22   : > { %p733_p13 = pnand %p731_p1, %p695_p12  ;;  %p740_p5 = por %p739_p6, %p738_p2 }
  0x24   : > { %p734_p0 = pneg %p733_p13 }
  0x26   : > { %p741_p10 = pnand %p740_p5, %p734_p0 }
  0x28   : > { %744 = shalt.err (!%p741_p10)
}
  0x29   : > { %631 = dma.hbm_to_vmem [thread:$0]  (!%p930_p11), %s1071_s3, 1024, %s192_s6, [#allocation6], %s845_s8, %s845_s8, %s846_s9  }
  0x2a   : > { %s953_s15 = sadd.s32 1, %s841_s21   ;;  %s29_s16 = sadd.s32 1, %s837_s20 }
  0x2b   : > { %s26_s17 = ssub.s32 %s841_s21, %s953_s15  ;;  %p36_p1 = scmp.ne.s32.totalorder %s837_s20, %s833_s19 }
  0x2c   : > { %p27_p2 = scmp.eq.s32.totalorder %s26_s17, 0  ;;  %p37_p6 = scmp.eq.s32.totalorder %s841_s21, 0 }
  0x2d   : > { %p1082_p12 = scmp.eq.s32.totalorder %s902_s22, 1  ;;  %p642_p7 = scmp.lt.s32.totalorder %s841_s21, 2 }
  0x2e   : > { %s969_s27 = scalar_select %p27_p2, %s837_s20, %s29_s16  }
  0x2f   : > { %p963_p3 = por %p1082_p12, %p36_p1  ;;  %p38_p9 = por %p37_p6, %p36_p1 }
  0x30   : > { %s208_s28 = sand.u32 1, %s837_s20   ;;  %s554_s30 = sshll.u32 %s841_s21, 7 }
  0x31   : > { %s1083_s23 = scalar_select %p963_p3, 1, 0 }
  0x32   : > { %s553_s29 = sshll.u32 %s208_s28, 3  ;;  %s976_s8 = scalar_lea.hbm %s1068_s0, %s554_s30 }
  0x33   : > { %s212_s9 = scalar_lea.vmem [#allocation2], %s553_s29  ;;  %p978_p11 = pnand %p642_p7, %p38_p9 }
  0x34   : > { %s219_s10 = sshll.u32 %s212_s9, 4  ;;  %s209_s12 = scalar_lea.sflag [#allocation3], %s208_s28  ;;  %s220_s10 = int_to_ptr.vmem [resolvable:$true] %s219_s10 }
  0x35   : > { %s745_s13 = scalar_lea.hbm %s976_s8, 128  ;;  %p747_p0 = pneg %p978_p11 }
  0x36   : > { %p746_p13 = scmp.ne.s32.totalorder %s976_s8, %s745_s13  ;;  %s750_s17 = scalar_lea.hbm %s1068_s0, 256 }
  0x37   : > { %p751_p1 = scmp.lt.s32.totalorder %s976_s8, %s1068_s0  ;;  %p752_p2 = scmp.lt.s32.totalorder %s750_s17, %s745_s13 }
  0x38   : > { %p748_p5 = pnand %p747_p0, %p746_p13 }
  0x39   : > { %p753_p6 = por %p752_p2, %p751_p1 }
  0x3a   : > { %p749_p10 = pneg %p748_p5 }
  0x3c   : > { %p754_p12 = pnand %p753_p6, %p749_p10 }
  0x3e   : > { %757 = shalt.err (!%p754_p12)
}
  0x3f   : > { %s758_s6 = scalar_lea.vmem %s220_s10, 128  ;;  %s847_s28 = smov [#allocation2]  }
  0x40   : > { %p759_p7 = scmp.ne.s32.totalorder %s220_s10, %s758_s6  ;;  %s763_s7 = sshll.u32 %s847_s28, 4  ;;  %s764_s7 = int_to_ptr.vmem [resolvable:$false] %s763_s7 }
  0x41   : > { %s765_s9 = scalar_lea.vmem %s764_s7, 256  ;;  %p766_p13 = scmp.lt.s32.totalorder %s220_s10, %s764_s7 }
  0x42   : > { %p761_p9 = pnand %p759_p7, %p747_p0  ;;  %p767_p5 = scmp.lt.s32.totalorder %s765_s9, %s758_s6 }
  0x44   : > { %p762_p3 = pneg %p761_p9  ;;  %p768_p4 = por %p767_p5, %p766_p13 }
  0x46   : > { %p769_p8 = pnand %p768_p4, %p762_p3 }
  0x48   : > { %772 = shalt.err (!%p769_p8)
}
  0x49   : > { %635 = dma.hbm_to_vmem [thread:$0]  (!%p978_p11), %s976_s8, 128, %s220_s10, %s209_s12  }
  0x4a   : > { %p1085_p10 = scmp.ne.s32.totalorder %s1080_s26, 0 }
  0x4b   : > { %s999_s13 = sand.u32 (!%p1085_p10), 1, %s833_s19   ;;  %p1086_p4 = scmp.ne.s32.totalorder (!%p1085_p10), %s1078_s24, 0 }
  0x4c   : > { %228 = sbr.rel (%p1085_p10) target bundleno = 499 (0x1f3), region = 40  ;;  %s556_s14 = sshll.u32 (!%p1085_p10), %s999_s13, 3 }
  0x4d   : > { %s231_s16 = scalar_lea.sflag (!%p1085_p10), [#allocation3], %s999_s13  ;;  %s234_s17 = scalar_lea.vmem (!%p1085_p10), [#allocation2], %s556_s14 }
  0x51   : > { %816 = dma.done.wait (%p1086_p4), %s231_s16, 128  }
  0x52   : > { %818 = vsyncadd (%p1086_p4), %s231_s16, 4294967168  ;;  %p1087_p8 = scmp.eq.s32.totalorder %s902_s22, 0 }
  0x54   : > { %820 = dma.done.wait (%p1087_p8), [#allocation6], 1152   ;;  %p1088_p3 = pmov %p1087_p8 }
  0x55   : > { %v848_v0 = vmov 0.0   ;;  %vm849_vm0 = vmmov 0   ;;  %v684_v1 = vld [vmem:[#allocation5] sm:$0xff]   ;;  %v270_v2 = vld [vmem:[%s234_s17] sm:$0xff]  ;;  %vm287_vm1 = vcmask 130048   ;;  %v688_v7 = vld [vmem:[#allocation7 + $0x20] sm:$0xff]  }
  0x56   : > { %822 = vsyncadd (%p1088_p3), [#allocation6], 4294966144  ;;  %587 = vmatprep.subr.bf16.mxu0 %v848_v0  ;;  %589 = vmatprep.mubr.msk.bf16.mxu0 %vm849_vm0, %v848_v0  ;;  %v271_v3 = vpack.c.bf16 %v270_v2, %v270_v2  ;;  %v685_v4 = vld [vmem:[#allocation7 + $0x38] sm:$0xff]   ;;  %v686_v5 = vld [vmem:[#allocation7 + $0x30] sm:$0xff]   ;;  %s573_s11 = sshll.u32 %s902_s22, 7  ;;  %s268_s12 = scalar_lea.vmem [#allocation8], %s556_s14 }
  0x57   : > { %593 = vmatprep.subr.bf16.mxu1 %v848_v0  ;;  %609 = vmatprep.mubr.msk.bf16.mxu1 %vm849_vm0, %v848_v0  ;;  %v687_v6 = vld [vmem:[#allocation7 + $0x28] sm:$0xff]   ;;  %v689_v8 = vld [vmem:[#allocation7 + $0x18] sm:$0xff]   ;;  %v690_v9 = vld [vmem:[#allocation7 + $0x10] sm:$0xff]   ;;  %s459_s30 = sshll.u32 %s268_s12, 4  ;;  %s1025_s28 = scalar_lea.hbm %s1073_s5, %s573_s11  ;;  %s1027_s30 = int_to_ptr.vmem [resolvable:$true] %s459_s30 }
  0x58   : > { %588 = vmatpush3.bf16.msra.mxu0 %v684_v1  ;;  %594 = vmatpush3.bf16.msra.mxu1 %v685_v4  ;;  %v691_v10 = vld [vmem:[#allocation7 + $0x8] sm:$0xff]   ;;  %v692_v11 = vld [vmem:[#allocation7] sm:$0xff]   ;;  %s446_s7 = scalar_lea.sflag [#allocation4], %s999_s13  ;;  %s773_s22 = scalar_lea.vmem %s1027_s30, 128 }
  0x59   : > { %595 = vmatprep.subr.bf16.mxu1 %v848_v0  ;;  %v560_v12 = vld [vmem:[%s1070_s2] ss:$0 sm:$0xff]  ;;  %p774_p11 = scmp.ne.s32.totalorder %s1027_s30, %s773_s22  ;;  %p1089_p0 = scmp.ne.s32.totalorder %s1083_s23, 0 }
  0x5a   : > { %v563_v20 = vld [vmem:[%s1072_s4] ss:$0 sm:$0xff]  ;;  %s850_s9 = smov [#allocation8]  }
  0x5b   : > { %590 = vmatmul.mubr.msk.bf16.vlgmr.msra.gmra.mxu0 %vm287_vm1, %v271_v3  ;;  %p775_p1 = pnand %p774_p11, %p1089_p0  ;;  %s777_s14 = sshll.u32 %s850_s9, 4  ;;  %s778_s14 = int_to_ptr.vmem [resolvable:$false] %s777_s14 }
  0x5c   : > { %596 = vmatpush3.bf16.msra.mxu1 %v686_v5  ;;  %s779_s16 = scalar_lea.vmem %s778_s14, 256  ;;  %p780_p6 = scmp.lt.s32.totalorder %s1027_s30, %s778_s14 }
  0x5d   : > { %597 = vmatprep.subr.bf16.mxu1 %v848_v0  ;;  %p776_p2 = pneg %p775_p1  ;;  %p781_p12 = scmp.lt.s32.totalorder %s779_s16, %s773_s22 }
  0x5f   : > { %p782_p7 = por %p781_p12, %p780_p6 }
  0x60   : > { %598 = vmatpush3.bf16.msra.mxu1 %v687_v6 }
  0x61   : > { %599 = vmatprep.subr.bf16.mxu1 %v848_v0  ;;  %p783_p9 = pnand %p782_p7, %p776_p2 }
  0x64   : > { %600 = vmatpush3.bf16.msra.mxu1 %v688_v7 }
  0x65   : > { %601 = vmatprep.subr.bf16.mxu1 %v848_v0 }
  0x68   : > { %602 = vmatpush3.bf16.msra.mxu1 %v689_v8 }
  0x69   : > { %603 = vmatprep.subr.bf16.mxu1 %v848_v0 }
  0x6c   : > { %604 = vmatpush3.bf16.msra.mxu1 %v690_v9 }
  0x6d   : > { %605 = vmatprep.subr.bf16.mxu1 %v848_v0 }
  0x70   : > { %606 = vmatpush3.bf16.msra.mxu1 %v691_v10 }
  0x71   : > { %607 = vmatprep.subr.bf16.mxu1 %v848_v0 }
  0x74   : > { %608 = vmatpush3.bf16.msra.mxu1 %v692_v11 }
 0x11b   : > { %v325_v13 = vpop.f32.mrf.mxu0 }
 0x11c   : > { %v326_v14 = vadd.f32 %v560_v12, %v325_v13 }
 0x11d   : > { %v591_v15 = vpop.f32.mrf.mxu0 }
 0x11e   : > { %v331_v16 = vmax.f32 %v326_v14, 0.0 }
 0x11f   : > { %v328_v17 = vpop.f32.mrf.mxu0 }
 0x120   : > { %v332_v18 = vpack.c.bf16 %v331_v16, %v331_v16 }
 0x121   : > { %v592_v19 = vpop.f32.mrf.mxu0 }
 0x122   : > { %610 = vmatmul.mubr.bf16.vlgmr.msra.gmra.mxu1 %v332_v18 }
 0x1e2   : > { %v438_v21 = vpop.f32.mrf.mxu1 }
 0x1e3   : > { %v439_v22 = vadd.f32 %v563_v20, %v438_v21 }
 0x1e4   : > { %v611_v23 = vpop.f32.mrf.mxu1 }
 0x1e5   : > { %444 = vst [vmem:[%s268_s12] sm:$0xff] %v439_v22 }
 0x1e6   : > { %v441_v24 = vpop.f32.mrf.mxu1 }
 0x1e7   : > { %786 = shalt.err (!%p783_p9)
}
 0x1e8   : > { %s787_s17 = scalar_lea.hbm %s1025_s28, 128  ;;  %s791_s26 = scalar_lea.hbm %s1073_s5, 256 }
 0x1e9   : > { %p788_p13 = scmp.ne.s32.totalorder %s1025_s28, %s787_s17  ;;  %p792_p4 = scmp.lt.s32.totalorder %s1025_s28, %s1073_s5 }
 0x1ea   : > { %p793_p8 = scmp.lt.s32.totalorder %s791_s26, %s787_s17 }
 0x1eb   : > { %p789_p5 = pnand %p788_p13, %p1089_p0 }
 0x1ec   : > { %p794_p3 = por %p793_p8, %p792_p4 }
 0x1ed   : > { %p790_p10 = pneg %p789_p5 }
 0x1ef   : > { %p795_p11 = pnand %p794_p3, %p790_p10 }
 0x1f1   : > { %798 = shalt.err (!%p795_p11)
}
 0x1f2   : > { %623 = dma.vmem_to_hbm [thread:$0]  (%p1089_p0), %s1027_s30, 128, %s1025_s28, %s446_s7   ;;  %v612_v25 = vpop.f32.mrf.mxu1 }
 0x1f3 PF: > { %s471_s11 = sand.u32 1, %s829_s18   ;;  %p1090_p1 = scmp.ne.s32.totalorder %s1079_s25, 0 }
 0x1f4   : > { %p1091_p2 = scmp.ge.s32.totalorder %s841_s21, 2  ;;  %s472_s12 = scalar_lea.sflag [#allocation4], %s471_s11 }
 0x1f6   : > { %p637_p6 = pnand %p1091_p2, %p1090_p1 }
 0x1f8   : > { %p638_p12 = pneg %p637_p6 }
 0x1fa   : > { %824 = dma.done.wait (%p638_p12), %s472_s12, 128  }
 0x1fb   : > { %826 = vsyncadd (%p638_p12), %s472_s12, 4294967168  ;;  %p19_p7 = scmp.ge.s32.totalorder %s953_s15, 4   ;;  %s1092_s18 = smov %s833_s19 }
 0x1fc   : > { %s1093_s19 = smov %s837_s20  ;;  %s1094_s20 = smov %s969_s27 }
 0x1fd   : > { %s1095_s21 = smov %s953_s15  ;;  %21 = sbr.rel (!%p19_p7) target bundleno = 6 (0x6), region = 93 }
 0x202   :  { %477 = vsyncpa [#allocation3], 1 }
 0x203   :  { %479 = vsyncpa [#allocation3 + $0x1], 1 }
 0x204   :  { %480 = vsyncpa [#allocation6], 1 }
 0x205   :  { %481 = vsyncpa [#allocation4], 1 }
 0x206   :  { %483 = vsyncpa [#allocation4 + $0x1], 1 }

// kernel: tpu_custom_call.1
= control target key start
LH: loop header
LB: loop body
LE: loop exit
PB: predicated region body
PF: predicated region fallthrough
CT: control target
= control target key end

     0   :  { %10 = vsyncpa [#allocation3], 0  ;;  %s1068_s0 = inlined_call_operand.hbm [shape: f32[16,16], index: 0, kind: input, shape index: {}]   ;;  %s1069_s1 = inlined_call_operand.hbm [shape: bf16[16,128], index: 1, kind: input, shape index: {}]   ;;  %s1070_s2 = inlined_call_operand.vmem [shape: f32[1,128], index: 2, kind: input, shape index: {}]   ;;  %s1071_s3 = inlined_call_operand.hbm [shape: bf16[128,128], index: 3, kind: input, shape index: {}]   ;;  %s1072_s4 = inlined_call_operand.vmem [shape: f32[1,128], index: 4, kind: input, shape index: {}]   ;;  %s1073_s5 = inlined_call_operand.hbm [shape: f32[16,128], index: 5, kind: output, shape index: {}]  }
   0x1   :  { %12 = vsyncpa [#allocation3 + $0x1], 0 }
   0x2   :  { %13 = vsyncpa [#allocation6], 0 }
   0x3   :  { %14 = vsyncpa [#allocation4], 0 }
   0x4   :  { %16 = vsyncpa [#allocation4 + $0x1], 0  ;;  %s881_s18 = smov 0   ;;  %s883_s19 = smov 0  }
   0x5   :  { %s885_s20 = smov 0   ;;  %s887_s21 = smov 0  }
   0x6 LB: > { %s902_s22 = sadd.s32 4294967295, %s841_s21   ;;  %s548_s23 = sadd.s32 4294967294, %s841_s21   ;;  %s841_s21 = sphi %s887_s21, %s1095_s21   ;;  %s837_s20 = sphi %s885_s20, %s1094_s20   ;;  %s833_s19 = sphi %s883_s19, %s1093_s19   ;;  %s829_s18 = sphi %s881_s18, %s1092_s18  }
   0x7   : > { %p42_p0 = scmp.ne.s32.totalorder %s833_s19, %s829_s18  ;;  %p1074_p1 = scmp.eq.s32.totalorder %s902_s22, 0 }
   0x8   : > { %p156_p3 = scmp.eq.s32.totalorder %s548_s23, 1  ;;  %p549_p5 = scmp.ge.s32.totalorder %s841_s21, 1 }
   0x9   : > { %p911_p4 = por %p1074_p1, %p42_p0  ;;  %p163_p7 = scmp.lt.s32.totalorder %s841_s21, 3 }
   0xa   : > { %p916_p6 = por %p156_p3, %p42_p0  ;;  %s843_s27 = smov [#allocation5]  }
   0xb   : > { %s1078_s24 = scalar_select %p911_p4, 1, 0 }
   0xc   : > { %s1079_s25 = scalar_select %p916_p6, 1, 0 }
   0xd   : > { %p921_p8 = pnand %p549_p5, %p163_p7  ;;  %s175_s28 = sshll.u32 %s843_s27, 4  ;;  %s176_s28 = int_to_ptr.vmem [resolvable:$true] %s175_s28 }
   0xe   : > { %s844_s30 = smov [#allocation7]   ;;  %s704_s7 = scalar_lea.vmem %s176_s28, 128 }
   0xf   : > { %s1080_s26 = scalar_select %p921_p8, 1, 0 }
  0x10   : > { %p625_p9 = pneg %p921_p8  ;;  %s191_s6 = sshll.u32 %s844_s30, 4  ;;  %s192_s6 = int_to_ptr.vmem [resolvable:$true] %s191_s6 }
  0x11   : > { %p705_p13 = scmp.ne.s32.totalorder %s176_s28, %s704_s7  ;;  %p712_p5 = scmp.lt.s32.totalorder %s176_s28, %s176_s28 }
  0x12   : > { %p930_p11 = pnand %p625_p9, %p1074_p1  ;;  %p713_p7 = scmp.lt.s32.totalorder %s704_s7, %s704_s7 }
  0x14   : > { %p695_p12 = pneg %p930_p11  ;;  %p714_p10 = por %p713_p7, %p712_p5 }
  0x16   : > { %p707_p0 = pnand %p705_p13, %p695_p12 }
  0x18   : > { %p708_p3 = pneg %p707_p0 }
  0x1a   : > { %p715_p9 = pnand %p714_p10, %p708_p3 }
  0x1c   : > { %718 = shalt.err (!%p715_p9)
}
  0x1d   : > { %s845_s8 = smov 64   ;;  %s846_s9 = smov 4  }
  0x1e   : > { %628 = dma.hbm_to_vmem [thread:$0]  (!%p930_p11), %s1069_s1, 128, %s176_s28, [#allocation6], %s845_s8, %s845_s8, %s846_s9  }
  0x1f   : > { %s730_s12 = scalar_lea.vmem %s192_s6, 1024  ;;  %p738_p2 = scmp.lt.s32.totalorder %s192_s6, %s192_s6 }
  0x20   : > { %p731_p1 = scmp.ne.s32.totalorder %s192_s6, %s730_s12  ;;  %p739_p6 = scmp.lt.s32.totalorder %s730_s12, %s730_s12 }
  0x22   : > { %p733_p13 = pnand %p731_p1, %p695_p12  ;;  %p740_p5 = por %p739_p6, %p738_p2 }
  0x24   : > { %p734_p0 = pneg %p733_p13 }
  0x26   : > { %p741_p10 = pnand %p740_p5, %p734_p0 }
  0x28   : > { %744 = shalt.err (!%p741_p10)
}
  0x29   : > { %631 = dma.hbm_to_vmem [thread:$0]  (!%p930_p11), %s1071_s3, 1024, %s192_s6, [#allocation6], %s845_s8, %s845_s8, %s846_s9  }
  0x2a   : > { %s953_s15 = sadd.s32 1, %s841_s21   ;;  %s29_s16 = sadd.s32 1, %s837_s20 }
  0x2b   : > { %s26_s17 = ssub.s32 %s841_s21, %s953_s15  ;;  %p36_p1 = scmp.ne.s32.totalorder %s837_s20, %s833_s19 }
  0x2c   : > { %p27_p2 = scmp.eq.s32.totalorder %s26_s17, 0  ;;  %p37_p6 = scmp.eq.s32.totalorder %s841_s21, 0 }
  0x2d   : > { %p1082_p12 = scmp.eq.s32.totalorder %s902_s22, 1  ;;  %p642_p7 = scmp.lt.s32.totalorder %s841_s21, 2 }
  0x2e   : > { %s969_s27 = scalar_select %p27_p2, %s837_s20, %s29_s16  }
  0x2f   : > { %p963_p3 = por %p1082_p12, %p36_p1  ;;  %p38_p9 = por %p37_p6, %p36_p1 }
  0x30   : > { %s208_s28 = sand.u32 1, %s837_s20   ;;  %s554_s30 = sshll.u32 %s841_s21, 7 }
  0x31   : > { %s1083_s23 = scalar_select %p963_p3, 1, 0 }
  0x32   : > { %s553_s29 = sshll.u32 %s208_s28, 3  ;;  %s976_s8 = scalar_lea.hbm %s1068_s0, %s554_s30 }
  0x33   : > { %s212_s9 = scalar_lea.vmem [#allocation2], %s553_s29  ;;  %p978_p11 = pnand %p642_p7, %p38_p9 }
  0x34   : > { %s219_s10 = sshll.u32 %s212_s9, 4  ;;  %s209_s12 = scalar_lea.sflag [#allocation3], %s208_s28  ;;  %s220_s10 = int_to_ptr.vmem [resolvable:$true] %s219_s10 }
  0x35   : > { %s745_s13 = scalar_lea.hbm %s976_s8, 128  ;;  %p747_p0 = pneg %p978_p11 }
  0x36   : > { %p746_p13 = scmp.ne.s32.totalorder %s976_s8, %s745_s13  ;;  %s750_s17 = scalar_lea.hbm %s1068_s0, 256 }
  0x37   : > { %p751_p1 = scmp.lt.s32.totalorder %s976_s8, %s1068_s0  ;;  %p752_p2 = scmp.lt.s32.totalorder %s750_s17, %s745_s13 }
  0x38   : > { %p748_p5 = pnand %p747_p0, %p746_p13 }
  0x39   : > { %p753_p6 = por %p752_p2, %p751_p1 }
  0x3a   : > { %p749_p10 = pneg %p748_p5 }
  0x3c   : > { %p754_p12 = pnand %p753_p6, %p749_p10 }
  0x3e   : > { %757 = shalt.err (!%p754_p12)
}
  0x3f   : > { %s758_s6 = scalar_lea.vmem %s220_s10, 128  ;;  %s847_s28 = smov [#allocation2]  }
  0x40   : > { %p759_p7 = scmp.ne.s32.totalorder %s220_s10, %s758_s6  ;;  %s763_s7 = sshll.u32 %s847_s28, 4  ;;  %s764_s7 = int_to_ptr.vmem [resolvable:$false] %s763_s7 }
  0x41   : > { %s765_s9 = scalar_lea.vmem %s764_s7, 256  ;;  %p766_p13 = scmp.lt.s32.totalorder %s220_s10, %s764_s7 }
  0x42   : > { %p761_p9 = pnand %p759_p7, %p747_p0  ;;  %p767_p5 = scmp.lt.s32.totalorder %s765_s9, %s758_s6 }
  0x44   : > { %p762_p3 = pneg %p761_p9  ;;  %p768_p4 = por %p767_p5, %p766_p13 }
  0x46   : > { %p769_p8 = pnand %p768_p4, %p762_p3 }
  0x48   : > { %772 = shalt.err (!%p769_p8)
}
  0x49   : > { %635 = dma.hbm_to_vmem [thread:$0]  (!%p978_p11), %s976_s8, 128, %s220_s10, %s209_s12  }
  0x4a   : > { %p1085_p10 = scmp.ne.s32.totalorder %s1080_s26, 0 }
  0x4b   : > { %s999_s13 = sand.u32 (!%p1085_p10), 1, %s833_s19   ;;  %p1086_p4 = scmp.ne.s32.totalorder (!%p1085_p10), %s1078_s24, 0 }
  0x4c   : > { %228 = sbr.rel (%p1085_p10) target bundleno = 499 (0x1f3), region = 40  ;;  %s556_s14 = sshll.u32 (!%p1085_p10), %s999_s13, 3 }
  0x4d   : > { %s231_s16 = scalar_lea.sflag (!%p1085_p10), [#allocation3], %s999_s13  ;;  %s234_s17 = scalar_lea.vmem (!%p1085_p10), [#allocation2], %s556_s14 }
  0x51   : > { %816 = dma.done.wait (%p1086_p4), %s231_s16, 128  }
  0x52   : > { %818 = vsyncadd (%p1086_p4), %s231_s16, 4294967168  ;;  %p1087_p8 = scmp.eq.s32.totalorder %s902_s22, 0 }
  0x54   : > { %820 = dma.done.wait (%p1087_p8), [#allocation6], 1152   ;;  %p1088_p3 = pmov %p1087_p8 }
  0x55   : > { %v848_v0 = vmov 0.0   ;;  %vm849_vm0 = vmmov 0   ;;  %v684_v1 = vld [vmem:[#allocation5] sm:$0xff]   ;;  %v270_v2 = vld [vmem:[%s234_s17] sm:$0xff]  ;;  %vm287_vm1 = vcmask 130048   ;;  %v688_v7 = vld [vmem:[#allocation7 + $0x20] sm:$0xff]  }
  0x56   : > { %822 = vsyncadd (%p1088_p3), [#allocation6], 4294966144  ;;  %587 = vmatprep.subr.bf16.mxu0 %v848_v0  ;;  %589 = vmatprep.mubr.msk.bf16.mxu0 %vm849_vm0, %v848_v0  ;;  %v271_v3 = vpack.c.bf16 %v270_v2, %v270_v2  ;;  %v685_v4 = vld [vmem:[#allocation7 + $0x38] sm:$0xff]   ;;  %v686_v5 = vld [vmem:[#allocation7 + $0x30] sm:$0xff]   ;;  %s573_s11 = sshll.u32 %s902_s22, 7  ;;  %s268_s12 = scalar_lea.vmem [#allocation8], %s556_s14 }
  0x57   : > { %593 = vmatprep.subr.bf16.mxu1 %v848_v0  ;;  %609 = vmatprep.mubr.msk.bf16.mxu1 %vm849_vm0, %v848_v0  ;;  %v687_v6 = vld [vmem:[#allocation7 + $0x28] sm:$0xff]   ;;  %v689_v8 = vld [vmem:[#allocation7 + $0x18] sm:$0xff]   ;;  %v690_v9 = vld [vmem:[#allocation7 + $0x10] sm:$0xff]   ;;  %s459_s30 = sshll.u32 %s268_s12, 4  ;;  %s1025_s28 = scalar_lea.hbm %s1073_s5, %s573_s11  ;;  %s1027_s30 = int_to_ptr.vmem [resolvable:$true] %s459_s30 }
  0x58   : > { %588 = vmatpush3.bf16.msra.mxu0 %v684_v1  ;;  %594 = vmatpush3.bf16.msra.mxu1 %v685_v4  ;;  %v691_v10 = vld [vmem:[#allocation7 + $0x8] sm:$0xff]   ;;  %v692_v11 = vld [vmem:[#allocation7] sm:$0xff]   ;;  %s446_s7 = scalar_lea.sflag [#allocation4], %s999_s13  ;;  %s773_s22 = scalar_lea.vmem %s1027_s30, 128 }
  0x59   : > { %595 = vmatprep.subr.bf16.mxu1 %v848_v0  ;;  %v560_v12 = vld [vmem:[%s1070_s2] ss:$0 sm:$0xff]  ;;  %p774_p11 = scmp.ne.s32.totalorder %s1027_s30, %s773_s22  ;;  %p1089_p0 = scmp.ne.s32.totalorder %s1083_s23, 0 }
  0x5a   : > { %v563_v20 = vld [vmem:[%s1072_s4] ss:$0 sm:$0xff]  ;;  %s850_s9 = smov [#allocation8]  }
  0x5b   : > { %590 = vmatmul.mubr.msk.bf16.vlgmr.msra.gmra.mxu0 %vm287_vm1, %v271_v3  ;;  %p775_p1 = pnand %p774_p11, %p1089_p0  ;;  %s777_s14 = sshll.u32 %s850_s9, 4  ;;  %s778_s14 = int_to_ptr.vmem [resolvable:$false] %s777_s14 }
  0x5c   : > { %596 = vmatpush3.bf16.msra.mxu1 %v686_v5  ;;  %s779_s16 = scalar_lea.vmem %s778_s14, 256  ;;  %p780_p6 = scmp.lt.s32.totalorder %s1027_s30, %s778_s14 }
  0x5d   : > { %597 = vmatprep.subr.bf16.mxu1 %v848_v0  ;;  %p776_p2 = pneg %p775_p1  ;;  %p781_p12 = scmp.lt.s32.totalorder %s779_s16, %s773_s22 }
  0x5f   : > { %p782_p7 = por %p781_p12, %p780_p6 }
  0x60   : > { %598 = vmatpush3.bf16.msra.mxu1 %v687_v6 }
  0x61   : > { %599 = vmatprep.subr.bf16.mxu1 %v848_v0  ;;  %p783_p9 = pnand %p782_p7, %p776_p2 }
  0x64   : > { %600 = vmatpush3.bf16.msra.mxu1 %v688_v7 }
  0x65   : > { %601 = vmatprep.subr.bf16.mxu1 %v848_v0 }
  0x68   : > { %602 = vmatpush3.bf16.msra.mxu1 %v689_v8 }
  0x69   : > { %603 = vmatprep.subr.bf16.mxu1 %v848_v0 }
  0x6c   : > { %604 = vmatpush3.bf16.msra.mxu1 %v690_v9 }
  0x6d   : > { %605 = vmatprep.subr.bf16.mxu1 %v848_v0 }
  0x70   : > { %606 = vmatpush3.bf16.msra.mxu1 %v691_v10 }
  0x71   : > { %607 = vmatprep.subr.bf16.mxu1 %v848_v0 }
  0x74   : > { %608 = vmatpush3.bf16.msra.mxu1 %v692_v11 }
 0x11b   : > { %v325_v13 = vpop.f32.mrf.mxu0 }
 0x11c   : > { %v326_v14 = vadd.f32 %v560_v12, %v325_v13 }
 0x11d   : > { %v591_v15 = vpop.f32.mrf.mxu0 }
 0x11e   : > { %v331_v16 = vmax.f32 %v326_v14, 0.0 }
 0x11f   : > { %v328_v17 = vpop.f32.mrf.mxu0 }
 0x120   : > { %v332_v18 = vpack.c.bf16 %v331_v16, %v331_v16 }
 0x121   : > { %v592_v19 = vpop.f32.mrf.mxu0 }
 0x122   : > { %610 = vmatmul.mubr.bf16.vlgmr.msra.gmra.mxu1 %v332_v18 }
 0x1e2   : > { %v438_v21 = vpop.f32.mrf.mxu1 }
 0x1e3   : > { %v439_v22 = vadd.f32 %v563_v20, %v438_v21 }
 0x1e4   : > { %v611_v23 = vpop.f32.mrf.mxu1 }
 0x1e5   : > { %444 = vst [vmem:[%s268_s12] sm:$0xff] %v439_v22 }
 0x1e6   : > { %v441_v24 = vpop.f32.mrf.mxu1 }
 0x1e7   : > { %786 = shalt.err (!%p783_p9)
}
 0x1e8   : > { %s787_s17 = scalar_lea.hbm %s1025_s28, 128  ;;  %s791_s26 = scalar_lea.hbm %s1073_s5, 256 }
 0x1e9   : > { %p788_p13 = scmp.ne.s32.totalorder %s1025_s28, %s787_s17  ;;  %p792_p4 = scmp.lt.s32.totalorder %s1025_s28, %s1073_s5 }
 0x1ea   : > { %p793_p8 = scmp.lt.s32.totalorder %s791_s26, %s787_s17 }
 0x1eb   : > { %p789_p5 = pnand %p788_p13, %p1089_p0 }
 0x1ec   : > { %p794_p3 = por %p793_p8, %p792_p4 }
 0x1ed   : > { %p790_p10 = pneg %p789_p5 }
 0x1ef   : > { %p795_p11 = pnand %p794_p3, %p790_p10 }
 0x1f1   : > { %798 = shalt.err (!%p795_p11)
}
 0x1f2   : > { %623 = dma.vmem_to_hbm [thread:$0]  (%p1089_p0), %s1027_s30, 128, %s1025_s28, %s446_s7   ;;  %v612_v25 = vpop.f32.mrf.mxu1 }
 0x1f3 PF: > { %s471_s11 = sand.u32 1, %s829_s18   ;;  %p1090_p1 = scmp.ne.s32.totalorder %s1079_s25, 0 }
 0x1f4   : > { %p1091_p2 = scmp.ge.s32.totalorder %s841_s21, 2  ;;  %s472_s12 = scalar_lea.sflag [#allocation4], %s471_s11 }
 0x1f6   : > { %p637_p6 = pnand %p1091_p2, %p1090_p1 }
 0x1f8   : > { %p638_p12 = pneg %p637_p6 }
 0x1fa   : > { %824 = dma.done.wait (%p638_p12), %s472_s12, 128  }
 0x1fb   : > { %826 = vsyncadd (%p638_p12), %s472_s12, 4294967168  ;;  %p19_p7 = scmp.ge.s32.totalorder %s953_s15, 4   ;;  %s1092_s18 = smov %s833_s19 }
 0x1fc   : > { %s1093_s19 = smov %s837_s20  ;;  %s1094_s20 = smov %s969_s27 }
 0x1fd   : > { %s1095_s21 = smov %s953_s15  ;;  %21 = sbr.rel (!%p19_p7) target bundleno = 6 (0x6), region = 93 }
 0x202   :  { %477 = vsyncpa [#allocation3], 1 }
 0x203   :  { %479 = vsyncpa [#allocation3 + $0x1], 1 }
 0x204   :  { %480 = vsyncpa [#allocation6], 1 }
 0x205   :  { %481 = vsyncpa [#allocation4], 1 }
 0x206   :  { %483 = vsyncpa [#allocation4 + $0x1], 1 }

</bundles_post_ra>
